<compile_context>
chip_gen: v7x
topology: tpu7x:2x2x1
jax: 0.10.0
libtpu: 0.0.40
codegen_flags: <defaults>
</compile_context>

<pallas_src>
import functools

import jax
import jax.numpy as jnp
from jax import lax
from jax.experimental import pallas as pl
from jax.experimental.pallas import tpu as pltpu

SCALE = 0.1          # ResBlock residual scale (f64 tensor in PyTorch, f32 here)
KSIZE = 3            # the module uses padding=1, i.e. SAME only for 3x3


def resblock_kernel(mask_ref, x_ref, w1_ref, b1_ref, w2_ref, b2_ref, out_ref,
                    *, W):
    """One batch-block per grid step.

    Rows (sublanes) = NB images x C channels; lanes = flattened H*W.

    mask_ref : (9, R, HW) f32  per-tap SAME-padding validity (1 inside image)
    x_ref    : (1, R, HW) f32
    w1_ref   : (9, R, R)  f32  per-tap weights, block-diagonal over NB images
    b1_ref   : (R, 1)     f32
    w2_ref   : (9, R, R)  f32
    b2_ref   : (R, 1)     f32
    out_ref  : (1, R, HW) f32
    """
    rows = x_ref.shape[1]
    hw = x_ref.shape[2]
    x = x_ref[0]                                        # (R, HW)

    def conv3x3(inp, w_ref, b_ref):
        # 3x3 SAME conv = sum over 9 taps of  w_tap @ (rolled, masked) plane.
        #  * pltpu.roll runs in the otherwise-idle XLU slot; the single
        #    per-tap mask handles both dy (top/bottom) and dx (row-wrap)
        #    zero padding in one multiply.
        #  * each tap is one small MXU dot (idle vmatmul slot) instead of
        #    cin broadcast-FMAs on the VPU.
        #  * bias is folded into the first partial accumulator; one partial
        #    per dy row so the adds are not a 9-deep serial chain.
        parts = []
        for r_i, dy in enumerate((-1, 0, 1)):
            acc = jnp.broadcast_to(b_ref[...], (rows, hw)) if r_i == 0 else None
            for c_i, dx in enumerate((-1, 0, 1)):
                t = r_i * 3 + c_i
                s = dy * W + dx                         # source offset in flat H*W
                if s == 0:                              # centre tap: no shift, mask == 1
                    plane = inp
                else:
                    # plane[:, i] = inp[:, i + s] where the source pixel is in
                    # the image, else 0 (mask zeroes every wrapped lane).
                    plane = pltpu.roll(inp, (-s) % hw, axis=1) * mask_ref[t]
                term = jnp.dot(w_ref[t], plane,
                               preferred_element_type=jnp.float32)
                acc = term if acc is None else acc + term
            parts.append(acc)
        return parts[0] + (parts[1] + parts[2])

    h1 = jnp.maximum(conv3x3(x, w1_ref, b1_ref), 0.0)   # conv1 + ReLU
    h2 = conv3x3(h1, w2_ref, b2_ref)                    # conv2
    out_ref[0] = h2 * jnp.float32(SCALE) + x            # scale + residual


@functools.partial(jax.jit, static_argnames=("images_per_step",))
def resblock_pallas(x_nchw, w1_oihw, b1, w2_oihw, b2, *, images_per_step=None):
    """x: (N, C, H, W) f32.  w*: PyTorch OIHW (C, C, 3, 3).  b*: (C,)."""
    N, Cin, H, W = x_nchw.shape
    Cout = w1_oihw.shape[0]
    assert w1_oihw.shape[2:] == (KSIZE, KSIZE) and w2_oihw.shape[2:] == (KSIZE, KSIZE), (
        "kernel implements the padding=1 (3x3 SAME) configuration of ResBlock")
    # The residual add (x += shortcut(x)) requires matching channel counts,
    # exactly as in the PyTorch module.
    assert Cout == Cin and w2_oihw.shape[:2] == (Cout, Cout), (
        "ResBlock residual add needs input_channels == output_channels")
    C, HW = Cin, H * W

    # Images folded onto sublanes per grid step: fill the 8 vreg sublanes when
    # C is small; degenerates to 1 image/step (batch-parallel grid for v7x
    # megacore) once C >= 8.
    if images_per_step is None:
        images_per_step = min(N, max(1, 8 // C))
    NB = max(1, min(N, images_per_step))
    while N % NB:
        NB -= 1
    R = NB * C
    G = N // NB

    f32 = jnp.float32
    x_blk = x_nchw.astype(f32).reshape(G, R, HW)            # free reshape

    # Per-tap weights (9, Cout, Cin), tap t = (dy+1)*3 + (dx+1), made
    # block-diagonal over the NB images folded into each grid step: (9, R, R).
    eye = jnp.eye(NB, dtype=f32)

    def prep_w(w_oihw):
        w_t = jnp.transpose(w_oihw.astype(f32), (2, 3, 0, 1)).reshape(9, Cout, Cin)
        return jnp.einsum("nm,toi->tnomi", eye, w_t).reshape(9, R, R)

    w1p, w2p = prep_w(w1_oihw), prep_w(w2_oihw)
    b1p = jnp.tile(b1.astype(f32), NB).reshape(R, 1)
    b2p = jnp.tile(b2.astype(f32), NB).reshape(R, 1)

    # One precomputed SAME-padding mask per tap (dy zero-fill and dx column
    # mask merged), pre-broadcast over the R sublane rows so the kernel does a
    # single elementwise multiply per tap with no in-kernel broadcasts.
    rr = jnp.arange(H, dtype=jnp.int32)[:, None]
    cc = jnp.arange(W, dtype=jnp.int32)[None, :]
    masks = jnp.stack([
        (((rr + dy) >= 0) & ((rr + dy) < H) &
         ((cc + dx) >= 0) & ((cc + dx) < W)).reshape(HW)
        for dy in (-1, 0, 1) for dx in (-1, 0, 1)
    ]).astype(f32)                                           # (9, HW)
    mask_b = jnp.broadcast_to(masks[:, None, :], (9, R, HW))

    kernel = functools.partial(resblock_kernel, W=W)
    out = pl.pallas_call(
        kernel,
        out_shape=jax.ShapeDtypeStruct((G, R, HW), f32),
        grid_spec=pltpu.PrefetchScalarGridSpec(
            num_scalar_prefetch=0,
            grid=(G,),
            in_specs=[
                pl.BlockSpec((9, R, HW), lambda n: (0, 0, 0)),   # masks (resident)
                pl.BlockSpec((1, R, HW), lambda n: (n, 0, 0)),   # x
                pl.BlockSpec((9, R, R), lambda n: (0, 0, 0)),    # w1 (resident)
                pl.BlockSpec((R, 1), lambda n: (0, 0)),          # b1
                pl.BlockSpec((9, R, R), lambda n: (0, 0, 0)),    # w2 (resident)
                pl.BlockSpec((R, 1), lambda n: (0, 0)),          # b2
            ],
            out_specs=pl.BlockSpec((1, R, HW), lambda n: (n, 0, 0)),
        ),
        compiler_params=pltpu.CompilerParams(
            dimension_semantics=("parallel",)),
    )(mask_b, x_blk, w1p, b1p, w2p, b2p)

    return out.reshape(N, Cout, H, W)


def reference_resblock(x_nchw, w1_oihw, b1, w2_oihw, b2):
    """Pure-JAX NCHW reference (HIGHEST precision ~ exact f32)."""
    dn = lax.conv_dimension_numbers(x_nchw.shape, w1_oihw.shape,
                                    ("NCHW", "OIHW", "NCHW"))
    h = lax.conv_general_dilated(x_nchw, w1_oihw, (1, 1), "SAME",
                                 dimension_numbers=dn,
                                 precision=lax.Precision.HIGHEST)
    h = h + b1[None, :, None, None]
    h = jnp.maximum(h, 0.0)
    h = lax.conv_general_dilated(h, w2_oihw, (1, 1), "SAME",
                                 dimension_numbers=dn,
                                 precision=lax.Precision.HIGHEST)
    h = h + b2[None, :, None, None]
    return h * jnp.float32(SCALE) + x_nchw


if __name__ == "__main__":
    # Shapes consistent with ResBlock(input_channels=4, output_channels=4,
    # kernel_size=3): batch=2, channels=4, spatial=16x16.
    N, C, Hs, Ws = 2, 4, 16, 16

    key = jax.random.PRNGKey(0)
    k_x, k_w1, k_b1, k_w2, k_b2 = jax.random.split(key, 5)

    # PyTorch conventions: NCHW input, OIHW weights.
    x_nchw = jax.random.normal(k_x, (N, C, Hs, Ws), dtype=jnp.float32)
    w1_pt = jax.random.normal(k_w1, (C, C, KSIZE, KSIZE), jnp.float32) * 0.1
    b1 = jax.random.normal(k_b1, (C,), jnp.float32) * 0.1
    w2_pt = jax.random.normal(k_w2, (C, C, KSIZE, KSIZE), jnp.float32) * 0.1
    b2 = jax.random.normal(k_b2, (C,), jnp.float32) * 0.1

    out_nchw = resblock_pallas(x_nchw, w1_pt, b1, w2_pt, b2)
    jax.block_until_ready(out_nchw)

    ref_nchw = reference_resblock(x_nchw, w1_pt, b1, w2_pt, b2)
    assert out_nchw.shape == (N, C, Hs, Ws)
    err = float(jnp.max(jnp.abs(out_nchw - ref_nchw)))
    # MXU f32 matmuls are pass-decomposed and need not be bit-identical to the
    # HIGHEST-precision XLA reference; 2e-3 is orders of magnitude below any
    # structural error (those show up as O(0.1)..O(1)) but above worst-case
    # pass-rounding noise.
    assert err < 2e-3, f"Pallas ResBlock mismatch vs JAX reference (max |err| = {err})"

    print("KERNEL_OK")
</pallas_src>

<mosaic_0001>
module attributes {stable_mosaic.version = 11 : i64} {
  func.func @resblock_kernel(%arg0: i32, %arg1: memref<9x8x256xf32, #tpu.memory_space<vmem>>, %arg2: memref<1x8x256xf32, #tpu.memory_space<vmem>>, %arg3: memref<9x8x8xf32, #tpu.memory_space<vmem>>, %arg4: memref<8x1xf32, #tpu.memory_space<vmem>>, %arg5: memref<9x8x8xf32, #tpu.memory_space<vmem>>, %arg6: memref<8x1xf32, #tpu.memory_space<vmem>>, %arg7: memref<1x8x256xf32, #tpu.memory_space<vmem>>) attributes {dimension_semantics = [#tpu.dimension_semantics<parallel>], iteration_bounds = array<i64: 1>, scalar_prefetch = 0 : i64, scratch_operands = 0 : i64, tpu.core_type = #tpu.core_type<tc>, window_params = [{pipeline_mode = #tpu.pipeline_mode<synchronous>, transform_indices = @transform_0, window_bounds = array<i64: 9, 8, 256>}, {transform_indices = @transform_1, window_bounds = array<i64: 1, 8, 256>}, {pipeline_mode = #tpu.pipeline_mode<synchronous>, transform_indices = @transform_2, window_bounds = array<i64: 9, 8, 8>}, {pipeline_mode = #tpu.pipeline_mode<synchronous>, transform_indices = @transform_3, window_bounds = array<i64: 8, 1>}, {pipeline_mode = #tpu.pipeline_mode<synchronous>, transform_indices = @transform_4, window_bounds = array<i64: 9, 8, 8>}, {pipeline_mode = #tpu.pipeline_mode<synchronous>, transform_indices = @transform_5, window_bounds = array<i64: 8, 1>}, {transform_indices = @transform_6, window_bounds = array<i64: 1, 8, 256>}]} {
    %c0 = arith.constant 0 : index
    %c0_0 = arith.constant 0 : index
    %c0_1 = arith.constant 0 : index
    %0 = vector.load %arg2[%c0, %c0_0, %c0_1] : memref<1x8x256xf32, #tpu.memory_space<vmem>>, vector<1x8x256xf32>
    %1 = vector.shape_cast %0 : vector<1x8x256xf32> to vector<8x256xf32>
    %c0_2 = arith.constant 0 : index
    %c0_3 = arith.constant 0 : index
    %2 = vector.load %arg4[%c0_2, %c0_3] : memref<8x1xf32, #tpu.memory_space<vmem>>, vector<8x1xf32>
    %3 = vector.shape_cast %2 : vector<8x1xf32> to vector<8x1xf32>
    %4 = vector.broadcast %3 : vector<8x1xf32> to vector<8x256xf32>
    %c17_i32 = arith.constant 17 : i32
    %5 = tpu.dynamic_rotate %1 by %c17_i32 dim 1 : vector<8x256xf32>, i32 -> vector<8x256xf32>
    %c0_4 = arith.constant 0 : index
    %c0_5 = arith.constant 0 : index
    %c0_6 = arith.constant 0 : index
    %6 = vector.load %arg1[%c0_4, %c0_5, %c0_6] : memref<9x8x256xf32, #tpu.memory_space<vmem>>, vector<1x8x256xf32>
    %7 = vector.shape_cast %6 : vector<1x8x256xf32> to vector<8x256xf32>
    %8 = arith.mulf %5, %7 : vector<8x256xf32>
    %c0_7 = arith.constant 0 : index
    %c0_8 = arith.constant 0 : index
    %c0_9 = arith.constant 0 : index
    %9 = vector.load %arg3[%c0_7, %c0_8, %c0_9] : memref<9x8x8xf32, #tpu.memory_space<vmem>>, vector<1x8x8xf32>
    %10 = vector.shape_cast %9 : vector<1x8x8xf32> to vector<8x8xf32>
    %cst = arith.constant dense<0.000000e+00> : vector<8x256xf32>
    %11 = tpu.matmul %10, %8, %cst {dimension_numbers = #tpu.dot_dimension_numbers<[1], [0], [0], [1], [0, 0, 1, 1], [], []>} : vector<8x8xf32>, vector<8x256xf32>, vector<8x256xf32> -> vector<8x256xf32>
    %12 = arith.addf %4, %11 : vector<8x256xf32>
    %c16_i32 = arith.constant 16 : i32
    %13 = tpu.dynamic_rotate %1 by %c16_i32 dim 1 : vector<8x256xf32>, i32 -> vector<8x256xf32>
    %c1 = arith.constant 1 : index
    %c0_10 = arith.constant 0 : index
    %c0_11 = arith.constant 0 : index
    %14 = vector.load %arg1[%c1, %c0_10, %c0_11] : memref<9x8x256xf32, #tpu.memory_space<vmem>>, vector<1x8x256xf32>
    %15 = vector.shape_cast %14 : vector<1x8x256xf32> to vector<8x256xf32>
    %16 = arith.mulf %13, %15 : vector<8x256xf32>
    %c1_12 = arith.constant 1 : index
    %c0_13 = arith.constant 0 : index
    %c0_14 = arith.constant 0 : index
    %17 = vector.load %arg3[%c1_12, %c0_13, %c0_14] : memref<9x8x8xf32, #tpu.memory_space<vmem>>, vector<1x8x8xf32>
    %18 = vector.shape_cast %17 : vector<1x8x8xf32> to vector<8x8xf32>
    %cst_15 = arith.constant dense<0.000000e+00> : vector<8x256xf32>
    %19 = tpu.matmul %18, %16, %cst_15 {dimension_numbers = #tpu.dot_dimension_numbers<[1], [0], [0], [1], [0, 0, 1, 1], [], []>} : vector<8x8xf32>, vector<8x256xf32>, vector<8x256xf32> -> vector<8x256xf32>
    %20 = arith.addf %12, %19 : vector<8x256xf32>
    %c15_i32 = arith.constant 15 : i32
    %21 = tpu.dynamic_rotate %1 by %c15_i32 dim 1 : vector<8x256xf32>, i32 -> vector<8x256xf32>
    %c2 = arith.constant 2 : index
    %c0_16 = arith.constant 0 : index
    %c0_17 = arith.constant 0 : index
    %22 = vector.load %arg1[%c2, %c0_16, %c0_17] : memref<9x8x256xf32, #tpu.memory_space<vmem>>, vector<1x8x256xf32>
    %23 = vector.shape_cast %22 : vector<1x8x256xf32> to vector<8x256xf32>
    %24 = arith.mulf %21, %23 : vector<8x256xf32>
    %c2_18 = arith.constant 2 : index
    %c0_19 = arith.constant 0 : index
    %c0_20 = arith.constant 0 : index
    %25 = vector.load %arg3[%c2_18, %c0_19, %c0_20] : memref<9x8x8xf32, #tpu.memory_space<vmem>>, vector<1x8x8xf32>
    %26 = vector.shape_cast %25 : vector<1x8x8xf32> to vector<8x8xf32>
    %cst_21 = arith.constant dense<0.000000e+00> : vector<8x256xf32>
    %27 = tpu.matmul %26, %24, %cst_21 {dimension_numbers = #tpu.dot_dimension_numbers<[1], [0], [0], [1], [0, 0, 1, 1], [], []>} : vector<8x8xf32>, vector<8x256xf32>, vector<8x256xf32> -> vector<8x256xf32>
    %28 = arith.addf %20, %27 : vector<8x256xf32>
    %c1_i32 = arith.constant 1 : i32
    %29 = tpu.dynamic_rotate %1 by %c1_i32 dim 1 : vector<8x256xf32>, i32 -> vector<8x256xf32>
    %c3 = arith.constant 3 : index
    %c0_22 = arith.constant 0 : index
    %c0_23 = arith.constant 0 : index
    %30 = vector.load %arg1[%c3, %c0_22, %c0_23] : memref<9x8x256xf32, #tpu.memory_space<vmem>>, vector<1x8x256xf32>
    %31 = vector.shape_cast %30 : vector<1x8x256xf32> to vector<8x256xf32>
    %32 = arith.mulf %29, %31 : vector<8x256xf32>
    %c3_24 = arith.constant 3 : index
    %c0_25 = arith.constant 0 : index
    %c0_26 = arith.constant 0 : index
    %33 = vector.load %arg3[%c3_24, %c0_25, %c0_26] : memref<9x8x8xf32, #tpu.memory_space<vmem>>, vector<1x8x8xf32>
    %34 = vector.shape_cast %33 : vector<1x8x8xf32> to vector<8x8xf32>
    %cst_27 = arith.constant dense<0.000000e+00> : vector<8x256xf32>
    %35 = tpu.matmul %34, %32, %cst_27 {dimension_numbers = #tpu.dot_dimension_numbers<[1], [0], [0], [1], [0, 0, 1, 1], [], []>} : vector<8x8xf32>, vector<8x256xf32>, vector<8x256xf32> -> vector<8x256xf32>
    %c4 = arith.constant 4 : index
    %c0_28 = arith.constant 0 : index
    %c0_29 = arith.constant 0 : index
    %36 = vector.load %arg3[%c4, %c0_28, %c0_29] : memref<9x8x8xf32, #tpu.memory_space<vmem>>, vector<1x8x8xf32>
    %37 = vector.shape_cast %36 : vector<1x8x8xf32> to vector<8x8xf32>
    %cst_30 = arith.constant dense<0.000000e+00> : vector<8x256xf32>
    %38 = tpu.matmul %37, %1, %cst_30 {dimension_numbers = #tpu.dot_dimension_numbers<[1], [0], [0], [1], [0, 0, 1, 1], [], []>} : vector<8x8xf32>, vector<8x256xf32>, vector<8x256xf32> -> vector<8x256xf32>
    %39 = arith.addf %35, %38 : vector<8x256xf32>
    %c255_i32 = arith.constant 255 : i32
    %40 = tpu.dynamic_rotate %1 by %c255_i32 dim 1 : vector<8x256xf32>, i32 -> vector<8x256xf32>
    %c5 = arith.constant 5 : index
    %c0_31 = arith.constant 0 : index
    %c0_32 = arith.constant 0 : index
    %41 = vector.load %arg1[%c5, %c0_31, %c0_32] : memref<9x8x256xf32, #tpu.memory_space<vmem>>, vector<1x8x256xf32>
    %42 = vector.shape_cast %41 : vector<1x8x256xf32> to vector<8x256xf32>
    %43 = arith.mulf %40, %42 : vector<8x256xf32>
    %c5_33 = arith.constant 5 : index
    %c0_34 = arith.constant 0 : index
    %c0_35 = arith.constant 0 : index
    %44 = vector.load %arg3[%c5_33, %c0_34, %c0_35] : memref<9x8x8xf32, #tpu.memory_space<vmem>>, vector<1x8x8xf32>
    %45 = vector.shape_cast %44 : vector<1x8x8xf32> to vector<8x8xf32>
    %cst_36 = arith.constant dense<0.000000e+00> : vector<8x256xf32>
    %46 = tpu.matmul %45, %43, %cst_36 {dimension_numbers = #tpu.dot_dimension_numbers<[1], [0], [0], [1], [0, 0, 1, 1], [], []>} : vector<8x8xf32>, vector<8x256xf32>, vector<8x256xf32> -> vector<8x256xf32>
    %47 = arith.addf %39, %46 : vector<8x256xf32>
    %c241_i32 = arith.constant 241 : i32
    %48 = tpu.dynamic_rotate %1 by %c241_i32 dim 1 : vector<8x256xf32>, i32 -> vector<8x256xf32>
    %c6 = arith.constant 6 : index
    %c0_37 = arith.constant 0 : index
    %c0_38 = arith.constant 0 : index
    %49 = vector.load %arg1[%c6, %c0_37, %c0_38] : memref<9x8x256xf32, #tpu.memory_space<vmem>>, vector<1x8x256xf32>
    %50 = vector.shape_cast %49 : vector<1x8x256xf32> to vector<8x256xf32>
    %51 = arith.mulf %48, %50 : vector<8x256xf32>
    %c6_39 = arith.constant 6 : index
    %c0_40 = arith.constant 0 : index
    %c0_41 = arith.constant 0 : index
    %52 = vector.load %arg3[%c6_39, %c0_40, %c0_41] : memref<9x8x8xf32, #tpu.memory_space<vmem>>, vector<1x8x8xf32>
    %53 = vector.shape_cast %52 : vector<1x8x8xf32> to vector<8x8xf32>
    %cst_42 = arith.constant dense<0.000000e+00> : vector<8x256xf32>
    %54 = tpu.matmul %53, %51, %cst_42 {dimension_numbers = #tpu.dot_dimension_numbers<[1], [0], [0], [1], [0, 0, 1, 1], [], []>} : vector<8x8xf32>, vector<8x256xf32>, vector<8x256xf32> -> vector<8x256xf32>
    %c240_i32 = arith.constant 240 : i32
    %55 = tpu.dynamic_rotate %1 by %c240_i32 dim 1 : vector<8x256xf32>, i32 -> vector<8x256xf32>
    %c7 = arith.constant 7 : index
    %c0_43 = arith.constant 0 : index
    %c0_44 = arith.constant 0 : index
    %56 = vector.load %arg1[%c7, %c0_43, %c0_44] : memref<9x8x256xf32, #tpu.memory_space<vmem>>, vector<1x8x256xf32>
    %57 = vector.shape_cast %56 : vector<1x8x256xf32> to vector<8x256xf32>
    %58 = arith.mulf %55, %57 : vector<8x256xf32>
    %c7_45 = arith.constant 7 : index
    %c0_46 = arith.constant 0 : index
    %c0_47 = arith.constant 0 : index
    %59 = vector.load %arg3[%c7_45, %c0_46, %c0_47] : memref<9x8x8xf32, #tpu.memory_space<vmem>>, vector<1x8x8xf32>
    %60 = vector.shape_cast %59 : vector<1x8x8xf32> to vector<8x8xf32>
    %cst_48 = arith.constant dense<0.000000e+00> : vector<8x256xf32>
    %61 = tpu.matmul %60, %58, %cst_48 {dimension_numbers = #tpu.dot_dimension_numbers<[1], [0], [0], [1], [0, 0, 1, 1], [], []>} : vector<8x8xf32>, vector<8x256xf32>, vector<8x256xf32> -> vector<8x256xf32>
    %62 = arith.addf %54, %61 : vector<8x256xf32>
    %c239_i32 = arith.constant 239 : i32
    %63 = tpu.dynamic_rotate %1 by %c239_i32 dim 1 : vector<8x256xf32>, i32 -> vector<8x256xf32>
    %c8 = arith.constant 8 : index
    %c0_49 = arith.constant 0 : index
    %c0_50 = arith.constant 0 : index
    %64 = vector.load %arg1[%c8, %c0_49, %c0_50] : memref<9x8x256xf32, #tpu.memory_space<vmem>>, vector<1x8x256xf32>
    %65 = vector.shape_cast %64 : vector<1x8x256xf32> to vector<8x256xf32>
    %66 = arith.mulf %63, %65 : vector<8x256xf32>
    %c8_51 = arith.constant 8 : index
    %c0_52 = arith.constant 0 : index
    %c0_53 = arith.constant 0 : index
    %67 = vector.load %arg3[%c8_51, %c0_52, %c0_53] : memref<9x8x8xf32, #tpu.memory_space<vmem>>, vector<1x8x8xf32>
    %68 = vector.shape_cast %67 : vector<1x8x8xf32> to vector<8x8xf32>
    %cst_54 = arith.constant dense<0.000000e+00> : vector<8x256xf32>
    %69 = tpu.matmul %68, %66, %cst_54 {dimension_numbers = #tpu.dot_dimension_numbers<[1], [0], [0], [1], [0, 0, 1, 1], [], []>} : vector<8x8xf32>, vector<8x256xf32>, vector<8x256xf32> -> vector<8x256xf32>
    %70 = arith.addf %62, %69 : vector<8x256xf32>
    %71 = arith.addf %47, %70 : vector<8x256xf32>
    %72 = arith.addf %28, %71 : vector<8x256xf32>
    %cst_55 = arith.constant 0.000000e+00 : f32
    %73 = vector.broadcast %cst_55 : f32 to vector<8x256xf32>
    %74 = arith.maximumf %72, %73 : vector<8x256xf32>
    %c0_56 = arith.constant 0 : index
    %c0_57 = arith.constant 0 : index
    %75 = vector.load %arg6[%c0_56, %c0_57] : memref<8x1xf32, #tpu.memory_space<vmem>>, vector<8x1xf32>
    %76 = vector.shape_cast %75 : vector<8x1xf32> to vector<8x1xf32>
    %77 = vector.broadcast %76 : vector<8x1xf32> to vector<8x256xf32>
    %c17_i32_58 = arith.constant 17 : i32
    %78 = tpu.dynamic_rotate %74 by %c17_i32_58 dim 1 : vector<8x256xf32>, i32 -> vector<8x256xf32>
    %c0_59 = arith.constant 0 : index
    %c0_60 = arith.constant 0 : index
    %c0_61 = arith.constant 0 : index
    %79 = vector.load %arg1[%c0_59, %c0_60, %c0_61] : memref<9x8x256xf32, #tpu.memory_space<vmem>>, vector<1x8x256xf32>
    %80 = vector.shape_cast %79 : vector<1x8x256xf32> to vector<8x256xf32>
    %81 = arith.mulf %78, %80 : vector<8x256xf32>
    %c0_62 = arith.constant 0 : index
    %c0_63 = arith.constant 0 : index
    %c0_64 = arith.constant 0 : index
    %82 = vector.load %arg5[%c0_62, %c0_63, %c0_64] : memref<9x8x8xf32, #tpu.memory_space<vmem>>, vector<1x8x8xf32>
    %83 = vector.shape_cast %82 : vector<1x8x8xf32> to vector<8x8xf32>
    %cst_65 = arith.constant dense<0.000000e+00> : vector<8x256xf32>
    %84 = tpu.matmul %83, %81, %cst_65 {dimension_numbers = #tpu.dot_dimension_numbers<[1], [0], [0], [1], [0, 0, 1, 1], [], []>} : vector<8x8xf32>, vector<8x256xf32>, vector<8x256xf32> -> vector<8x256xf32>
    %85 = arith.addf %77, %84 : vector<8x256xf32>
    %c16_i32_66 = arith.constant 16 : i32
    %86 = tpu.dynamic_rotate %74 by %c16_i32_66 dim 1 : vector<8x256xf32>, i32 -> vector<8x256xf32>
    %c1_67 = arith.constant 1 : index
    %c0_68 = arith.constant 0 : index
    %c0_69 = arith.constant 0 : index
    %87 = vector.load %arg1[%c1_67, %c0_68, %c0_69] : memref<9x8x256xf32, #tpu.memory_space<vmem>>, vector<1x8x256xf32>
    %88 = vector.shape_cast %87 : vector<1x8x256xf32> to vector<8x256xf32>
    %89 = arith.mulf %86, %88 : vector<8x256xf32>
    %c1_70 = arith.constant 1 : index
    %c0_71 = arith.constant 0 : index
    %c0_72 = arith.constant 0 : index
    %90 = vector.load %arg5[%c1_70, %c0_71, %c0_72] : memref<9x8x8xf32, #tpu.memory_space<vmem>>, vector<1x8x8xf32>
    %91 = vector.shape_cast %90 : vector<1x8x8xf32> to vector<8x8xf32>
    %cst_73 = arith.constant dense<0.000000e+00> : vector<8x256xf32>
    %92 = tpu.matmul %91, %89, %cst_73 {dimension_numbers = #tpu.dot_dimension_numbers<[1], [0], [0], [1], [0, 0, 1, 1], [], []>} : vector<8x8xf32>, vector<8x256xf32>, vector<8x256xf32> -> vector<8x256xf32>
    %93 = arith.addf %85, %92 : vector<8x256xf32>
    %c15_i32_74 = arith.constant 15 : i32
    %94 = tpu.dynamic_rotate %74 by %c15_i32_74 dim 1 : vector<8x256xf32>, i32 -> vector<8x256xf32>
    %c2_75 = arith.constant 2 : index
    %c0_76 = arith.constant 0 : index
    %c0_77 = arith.constant 0 : index
    %95 = vector.load %arg1[%c2_75, %c0_76, %c0_77] : memref<9x8x256xf32, #tpu.memory_space<vmem>>, vector<1x8x256xf32>
    %96 = vector.shape_cast %95 : vector<1x8x256xf32> to vector<8x256xf32>
    %97 = arith.mulf %94, %96 : vector<8x256xf32>
    %c2_78 = arith.constant 2 : index
    %c0_79 = arith.constant 0 : index
    %c0_80 = arith.constant 0 : index
    %98 = vector.load %arg5[%c2_78, %c0_79, %c0_80] : memref<9x8x8xf32, #tpu.memory_space<vmem>>, vector<1x8x8xf32>
    %99 = vector.shape_cast %98 : vector<1x8x8xf32> to vector<8x8xf32>
    %cst_81 = arith.constant dense<0.000000e+00> : vector<8x256xf32>
    %100 = tpu.matmul %99, %97, %cst_81 {dimension_numbers = #tpu.dot_dimension_numbers<[1], [0], [0], [1], [0, 0, 1, 1], [], []>} : vector<8x8xf32>, vector<8x256xf32>, vector<8x256xf32> -> vector<8x256xf32>
    %101 = arith.addf %93, %100 : vector<8x256xf32>
    %c1_i32_82 = arith.constant 1 : i32
    %102 = tpu.dynamic_rotate %74 by %c1_i32_82 dim 1 : vector<8x256xf32>, i32 -> vector<8x256xf32>
    %c3_83 = arith.constant 3 : index
    %c0_84 = arith.constant 0 : index
    %c0_85 = arith.constant 0 : index
    %103 = vector.load %arg1[%c3_83, %c0_84, %c0_85] : memref<9x8x256xf32, #tpu.memory_space<vmem>>, vector<1x8x256xf32>
    %104 = vector.shape_cast %103 : vector<1x8x256xf32> to vector<8x256xf32>
    %105 = arith.mulf %102, %104 : vector<8x256xf32>
    %c3_86 = arith.constant 3 : index
    %c0_87 = arith.constant 0 : index
    %c0_88 = arith.constant 0 : index
    %106 = vector.load %arg5[%c3_86, %c0_87, %c0_88] : memref<9x8x8xf32, #tpu.memory_space<vmem>>, vector<1x8x8xf32>
    %107 = vector.shape_cast %106 : vector<1x8x8xf32> to vector<8x8xf32>
    %cst_89 = arith.constant dense<0.000000e+00> : vector<8x256xf32>
    %108 = tpu.matmul %107, %105, %cst_89 {dimension_numbers = #tpu.dot_dimension_numbers<[1], [0], [0], [1], [0, 0, 1, 1], [], []>} : vector<8x8xf32>, vector<8x256xf32>, vector<8x256xf32> -> vector<8x256xf32>
    %c4_90 = arith.constant 4 : index
    %c0_91 = arith.constant 0 : index
    %c0_92 = arith.constant 0 : index
    %109 = vector.load %arg5[%c4_90, %c0_91, %c0_92] : memref<9x8x8xf32, #tpu.memory_space<vmem>>, vector<1x8x8xf32>
    %110 = vector.shape_cast %109 : vector<1x8x8xf32> to vector<8x8xf32>
    %cst_93 = arith.constant dense<0.000000e+00> : vector<8x256xf32>
    %111 = tpu.matmul %110, %74, %cst_93 {dimension_numbers = #tpu.dot_dimension_numbers<[1], [0], [0], [1], [0, 0, 1, 1], [], []>} : vector<8x8xf32>, vector<8x256xf32>, vector<8x256xf32> -> vector<8x256xf32>
    %112 = arith.addf %108, %111 : vector<8x256xf32>
    %c255_i32_94 = arith.constant 255 : i32
    %113 = tpu.dynamic_rotate %74 by %c255_i32_94 dim 1 : vector<8x256xf32>, i32 -> vector<8x256xf32>
    %c5_95 = arith.constant 5 : index
    %c0_96 = arith.constant 0 : index
    %c0_97 = arith.constant 0 : index
    %114 = vector.load %arg1[%c5_95, %c0_96, %c0_97] : memref<9x8x256xf32, #tpu.memory_space<vmem>>, vector<1x8x256xf32>
    %115 = vector.shape_cast %114 : vector<1x8x256xf32> to vector<8x256xf32>
    %116 = arith.mulf %113, %115 : vector<8x256xf32>
    %c5_98 = arith.constant 5 : index
    %c0_99 = arith.constant 0 : index
    %c0_100 = arith.constant 0 : index
    %117 = vector.load %arg5[%c5_98, %c0_99, %c0_100] : memref<9x8x8xf32, #tpu.memory_space<vmem>>, vector<1x8x8xf32>
    %118 = vector.shape_cast %117 : vector<1x8x8xf32> to vector<8x8xf32>
    %cst_101 = arith.constant dense<0.000000e+00> : vector<8x256xf32>
    %119 = tpu.matmul %118, %116, %cst_101 {dimension_numbers = #tpu.dot_dimension_numbers<[1], [0], [0], [1], [0, 0, 1, 1], [], []>} : vector<8x8xf32>, vector<8x256xf32>, vector<8x256xf32> -> vector<8x256xf32>
    %120 = arith.addf %112, %119 : vector<8x256xf32>
    %c241_i32_102 = arith.constant 241 : i32
    %121 = tpu.dynamic_rotate %74 by %c241_i32_102 dim 1 : vector<8x256xf32>, i32 -> vector<8x256xf32>
    %c6_103 = arith.constant 6 : index
    %c0_104 = arith.constant 0 : index
    %c0_105 = arith.constant 0 : index
    %122 = vector.load %arg1[%c6_103, %c0_104, %c0_105] : memref<9x8x256xf32, #tpu.memory_space<vmem>>, vector<1x8x256xf32>
    %123 = vector.shape_cast %122 : vector<1x8x256xf32> to vector<8x256xf32>
    %124 = arith.mulf %121, %123 : vector<8x256xf32>
    %c6_106 = arith.constant 6 : index
    %c0_107 = arith.constant 0 : index
    %c0_108 = arith.constant 0 : index
    %125 = vector.load %arg5[%c6_106, %c0_107, %c0_108] : memref<9x8x8xf32, #tpu.memory_space<vmem>>, vector<1x8x8xf32>
    %126 = vector.shape_cast %125 : vector<1x8x8xf32> to vector<8x8xf32>
    %cst_109 = arith.constant dense<0.000000e+00> : vector<8x256xf32>
    %127 = tpu.matmul %126, %124, %cst_109 {dimension_numbers = #tpu.dot_dimension_numbers<[1], [0], [0], [1], [0, 0, 1, 1], [], []>} : vector<8x8xf32>, vector<8x256xf32>, vector<8x256xf32> -> vector<8x256xf32>
    %c240_i32_110 = arith.constant 240 : i32
    %128 = tpu.dynamic_rotate %74 by %c240_i32_110 dim 1 : vector<8x256xf32>, i32 -> vector<8x256xf32>
    %c7_111 = arith.constant 7 : index
    %c0_112 = arith.constant 0 : index
    %c0_113 = arith.constant 0 : index
    %129 = vector.load %arg1[%c7_111, %c0_112, %c0_113] : memref<9x8x256xf32, #tpu.memory_space<vmem>>, vector<1x8x256xf32>
    %130 = vector.shape_cast %129 : vector<1x8x256xf32> to vector<8x256xf32>
    %131 = arith.mulf %128, %130 : vector<8x256xf32>
    %c7_114 = arith.constant 7 : index
    %c0_115 = arith.constant 0 : index
    %c0_116 = arith.constant 0 : index
    %132 = vector.load %arg5[%c7_114, %c0_115, %c0_116] : memref<9x8x8xf32, #tpu.memory_space<vmem>>, vector<1x8x8xf32>
    %133 = vector.shape_cast %132 : vector<1x8x8xf32> to vector<8x8xf32>
    %cst_117 = arith.constant dense<0.000000e+00> : vector<8x256xf32>
    %134 = tpu.matmul %133, %131, %cst_117 {dimension_numbers = #tpu.dot_dimension_numbers<[1], [0], [0], [1], [0, 0, 1, 1], [], []>} : vector<8x8xf32>, vector<8x256xf32>, vector<8x256xf32> -> vector<8x256xf32>
    %135 = arith.addf %127, %134 : vector<8x256xf32>
    %c239_i32_118 = arith.constant 239 : i32
    %136 = tpu.dynamic_rotate %74 by %c239_i32_118 dim 1 : vector<8x256xf32>, i32 -> vector<8x256xf32>
    %c8_119 = arith.constant 8 : index
    %c0_120 = arith.constant 0 : index
    %c0_121 = arith.constant 0 : index
    %137 = vector.load %arg1[%c8_119, %c0_120, %c0_121] : memref<9x8x256xf32, #tpu.memory_space<vmem>>, vector<1x8x256xf32>
    %138 = vector.shape_cast %137 : vector<1x8x256xf32> to vector<8x256xf32>
    %139 = arith.mulf %136, %138 : vector<8x256xf32>
    %c8_122 = arith.constant 8 : index
    %c0_123 = arith.constant 0 : index
    %c0_124 = arith.constant 0 : index
    %140 = vector.load %arg5[%c8_122, %c0_123, %c0_124] : memref<9x8x8xf32, #tpu.memory_space<vmem>>, vector<1x8x8xf32>
    %141 = vector.shape_cast %140 : vector<1x8x8xf32> to vector<8x8xf32>
    %cst_125 = arith.constant dense<0.000000e+00> : vector<8x256xf32>
    %142 = tpu.matmul %141, %139, %cst_125 {dimension_numbers = #tpu.dot_dimension_numbers<[1], [0], [0], [1], [0, 0, 1, 1], [], []>} : vector<8x8xf32>, vector<8x256xf32>, vector<8x256xf32> -> vector<8x256xf32>
    %143 = arith.addf %135, %142 : vector<8x256xf32>
    %144 = arith.addf %120, %143 : vector<8x256xf32>
    %145 = arith.addf %101, %144 : vector<8x256xf32>
    %cst_126 = arith.constant 1.000000e-01 : f32
    %146 = vector.broadcast %cst_126 : f32 to vector<8x256xf32>
    %147 = arith.mulf %145, %146 : vector<8x256xf32>
    %148 = arith.addf %147, %1 : vector<8x256xf32>
    %c0_127 = arith.constant 0 : index
    %c0_128 = arith.constant 0 : index
    %c0_129 = arith.constant 0 : index
    %149 = vector.load %arg7[%c0_127, %c0_128, %c0_129] : memref<1x8x256xf32, #tpu.memory_space<vmem>>, vector<1x8x256xf32>
    %150 = vector.shape_cast %149 : vector<1x8x256xf32> to vector<8x256xf32>
    %151 = vector.shape_cast %148 : vector<8x256xf32> to vector<1x8x256xf32>
    tpu.vector_store %arg7[%c0_127, %c0_128, %c0_129], %151 {strides = array<i32>} : memref<1x8x256xf32, #tpu.memory_space<vmem>>, vector<1x8x256xf32>,
    return
  }
  func.func @transform_0(%arg0: i32) -> (i32, i32, i32) {
    %c0_i32 = arith.constant 0 : i32
    %c0_i32_0 = arith.constant 0 : i32
    %c0_i32_1 = arith.constant 0 : i32
    %c0_i32_2 = arith.constant 0 : i32
    return %c0_i32, %c0_i32_0, %c0_i32_1 : i32, i32, i32
  }
  func.func @transform_1(%arg0: i32) -> (i32, i32, i32) {
    %c0_i32 = arith.constant 0 : i32
    %c0_i32_0 = arith.constant 0 : i32
    %c0_i32_1 = arith.constant 0 : i32
    return %arg0, %c0_i32, %c0_i32_0 : i32, i32, i32
  }
  func.func @transform_2(%arg0: i32) -> (i32, i32, i32) {
    %c0_i32 = arith.constant 0 : i32
    %c0_i32_0 = arith.constant 0 : i32
    %c0_i32_1 = arith.constant 0 : i32
    %c0_i32_2 = arith.constant 0 : i32
    return %c0_i32, %c0_i32_0, %c0_i32_1 : i32, i32, i32
  }
  func.func @transform_3(%arg0: i32) -> (i32, i32) {
    %c0_i32 = arith.constant 0 : i32
    %c0_i32_0 = arith.constant 0 : i32
    %c0_i32_1 = arith.constant 0 : i32
    return %c0_i32, %c0_i32_0 : i32, i32
  }
  func.func @transform_4(%arg0: i32) -> (i32, i32, i32) {
    %c0_i32 = arith.constant 0 : i32
    %c0_i32_0 = arith.constant 0 : i32
    %c0_i32_1 = arith.constant 0 : i32
    %c0_i32_2 = arith.constant 0 : i32
    return %c0_i32, %c0_i32_0, %c0_i32_1 : i32, i32, i32
  }
  func.func @transform_5(%arg0: i32) -> (i32, i32) {
    %c0_i32 = arith.constant 0 : i32
    %c0_i32_0 = arith.constant 0 : i32
    %c0_i32_1 = arith.constant 0 : i32
    return %c0_i32, %c0_i32_0 : i32, i32
  }
  func.func @transform_6(%arg0: i32) -> (i32, i32, i32) {
    %c0_i32 = arith.constant 0 : i32
    %c0_i32_0 = arith.constant 0 : i32
    %c0_i32_1 = arith.constant 0 : i32
    return %arg0, %c0_i32, %c0_i32_0 : i32, i32, i32
  }
}

</mosaic_0001>

<bundles_post_ra>
// kernel: tile.13
= control target key start
LH: loop header
LB: loop body
LE: loop exit
PB: predicated region body
PF: predicated region fallthrough
CT: control target
= control target key end

     0   :  { %s22_s0 = inlined_call_operand.vmem [shape: f32[4], index: 0, kind: input, shape index: {}]   ;;  %s23_s1 = inlined_call_operand.vmem [shape: f32[2,4], index: 1, kind: output, shape index: {}]  }
   0x1   :  { %v4_v0 = vld [vmem:[%s22_s0] ss:$0 sm:$0xff] }
   0x2   :  { %5 = vst [vmem:[%s23_s1] sm:$0x3] %v4_v0 }

// kernel: tile.1
= control target key start
LH: loop header
LB: loop body
LE: loop exit
PB: predicated region body
PF: predicated region fallthrough
CT: control target
= control target key end

     0   :  { %s34_s8 = smov 125   ;;  %vm7_vm0 = vcmask 7168   ;;  %s35_s11 = smov 126   ;;  %s61_s0 = inlined_call_operand.vmem [shape: f32[2,4], index: 0, kind: input, shape index: {}]   ;;  %s62_s1 = inlined_call_operand.vmem [shape: f32[8,1], index: 1, kind: output, shape index: {}]  }
   0x1   :  { %v4_v0 = vld [vmem:[%s61_s0] sm:$0x3]  ;;  %s33_s0 = smov 127  }
   0x2   :  { %5 = vst [vmem:[#allocation0] sm:$0x3] %v4_v0 }
   0x9   :  { %v9_v1 = vld [vmem:[#allocation0] sm:$0x3]  }
   0xa   :  { %v21_v2 = vld [vmem:[#allocation0] sm:$0x3]   ;;  %10 = vrot.lane.b32.xlu0 %v9_v1, %s33_s0 }
   0xb   :  { %22 = vrot.lane.b32.xlu1 %v21_v2, %s34_s8  ;;  %v6_v3 = vld [vmem:[#allocation0] sm:$0x3]  }
   0xc   :  { %v15_v4 = vld [vmem:[#allocation0] sm:$0x3]   ;;  %8 = vst.msk [vmem:[%s62_s1] ss:$4 sm:$0x3] %vm7_vm0, %v6_v3  }
   0xe   :  { %16 = vrot.lane.b32.xlu0 %v15_v4, %s35_s11 }
  0x7c   :  { %v11_v5 = vpop.permute.xlu0 %10  }
  0x7d   :  { %v23_v6 = vpop.permute.xlu1 %22   ;;  %27 = vst.msk [vmem:[%s62_s1 + $0x1] ss:$4 sm:$0x3] %vm7_vm0, %v11_v5  }
  0x7e   :  { %29 = vst.msk [vmem:[%s62_s1 + $0x3] ss:$4 sm:$0x3] %vm7_vm0, %v23_v6  }
  0x80   :  { %v17_v7 = vpop.permute.xlu0 %16  }
  0x81   :  { %28 = vst.msk [vmem:[%s62_s1 + $0x2] ss:$4 sm:$0x3] %vm7_vm0, %v17_v7  }

// kernel: resblock_pallas.1
= control target key start
LH: loop header
LB: loop body
LE: loop exit
PB: predicated region body
PF: predicated region fallthrough
CT: control target
= control target key end

     0   :  { %v1700_v1 = vmov 0.0   ;;  %s1701_s23 = smov 16   ;;  %s1702_s24 = smov 17   ;;  %v1709_v3 = vmov 0   ;;  %v35_v5 = vlaneseq  ;;  %vm45_vm3 = vcmask 64512   ;;  %s2095_s1 = inlined_call_operand.vmem [shape: f32[1,8,256], index: 1, kind: input, shape index: {}]   ;;  %s2096_s3 = inlined_call_operand.vmem [shape: f32[8,1], index: 3, kind: input, shape index: {}]   ;;  %s2097_s0 = inlined_call_operand.vmem [shape: f32[9,8,256], index: 0, kind: input, shape index: {}]   ;;  %s2098_s2 = inlined_call_operand.vmem [shape: f32[9,8,8], index: 2, kind: input, shape index: {}]   ;;  %s2099_s5 = inlined_call_operand.vmem [shape: f32[8,1], index: 5, kind: input, shape index: {}]   ;;  %s2100_s4 = inlined_call_operand.vmem [shape: f32[9,8,8], index: 4, kind: input, shape index: {}]   ;;  %s2101_s6 = inlined_call_operand.vmem [shape: f32[1,8,256], index: 6, kind: output, shape index: {}]  }
   0x1   :  { %v1748_v0 = vld [vmem:[%s2095_s1] sm:$0xff]  ;;  %113 = vmatprep.mubr.f32.mxu0 %v1700_v1  ;;  %910 = vmatprep.mubr.f32.mxu1 %v1700_v1  ;;  %v1759_v2 = vld [vmem:[%s2095_s1 + $0x8] sm:$0xff]  ;;  %s1703_s27 = smov 15   ;;  %s1704_s28 = smov 1   ;;  %v1799_v9 = vld [vmem:[%s2097_s0 + $0x18] sm:$0xff] }
   0x2   :  { %122 = vrot.lane.b32.xlu1 %v1748_v0, %s1701_s23  ;;  %31 = vrot.lane.b32.xlu0 %v1748_v0, %s1702_s24  ;;  %s1705_s1 = smov 127   ;;  %s1706_s29 = smov 112   ;;  %v25_v4 = vld [vmem:[%s2096_s3] sm:$0xff]  ;;  %v1792_v6 = vand.u32 127, %v35_v5  ;;  %v1804_v10 = vld [vmem:[%s2097_s0 + $0x8] sm:$0xff] }
   0x3   :  { %s1707_s30 = smov 113   ;;  %s1708_s7 = smov 111   ;;  %1699 = vset.pattern.permute.xlu0 %v1709_v3  ;;  %v1809_v11 = vld [vmem:[%s2097_s0] sm:$0xff]  ;;  %v1814_v13 = vld [vmem:[%s2097_s0 + $0x10] sm:$0xff]  ;;  %v1835_v24 = vld [vmem:[%s2097_s0 + $0x28] sm:$0xff] }
   0x4   :  { %vm126_vm0 = vcmp.lt.s32.totalorder %v1792_v6, 16  ;;  %vm37_vm1 = vcmp.lt.s32.totalorder %v1792_v6, 17  ;;  %vm216_vm2 = vcmp.lt.s32.totalorder %v1792_v6, 15  ;;  %v44_v23 = vld [vmem:[%s2098_s2] sm:$0xff]  ;;  %v1608_v32 = vld [vmem:[%s2098_s2 + $0x8] sm:$0xff]  ;;  %vm306_vm4 = vcmp.lt.s32.totalorder %v1792_v6, 1 }
   0x5   :  { %v1847_v30 = vld [vmem:[%s2097_s0 + $0x20] sm:$0xff]  ;;  %v1862_v36 = vld [vmem:[%s2097_s0 + $0x38] sm:$0xff]  ;;  %v1612_v37 = vld [vmem:[%s2098_s2 + $0x10] sm:$0xff]  ;;  %vm470_vm5 = vcmp.lt.s32.totalorder %v1792_v6, 127  ;;  %vm574_vm6 = vcmp.lt.s32.totalorder %v1792_v6, 112  ;;  %vm560_vm7 = vcmp.lt.s32.totalorder %v1792_v6, 113 }
   0x6   :  { %124 = vrot.lane.b32.xlu1 %v1759_v2, %s1701_s23  ;;  %33 = vrot.lane.b32.xlu0 %v1759_v2, %s1702_s24  ;;  %v1877_v42 = vld [vmem:[%s2097_s0 + $0x30] sm:$0xff]  ;;  %v1884_v44 = vld [vmem:[%s2097_s0 + $0x58] sm:$0xff]  ;;  %vm736_vm8 = vcmp.lt.s32.totalorder %v1792_v6, 111 }
   0x7   :  { %v1617_v46 = vld [vmem:[%s2098_s2 + $0x20] sm:$0xff]  ;;  %v1899_v51 = vld [vmem:[%s2097_s0 + $0x50] sm:$0xff]  ;;  %v1906_v53 = vld [vmem:[%s2097_s0 + $0x78] sm:$0xff] }
   0x8   :  { %v1616_v55 = vld [vmem:[%s2098_s2 + $0x18] sm:$0xff]  ;;  %v1921_v60 = vld [vmem:[%s2097_s0 + $0x70] sm:$0xff]  ;;  %v1928_v62 = vld [vmem:[%s2097_s0 + $0x68] sm:$0xff] }
   0x9   :  { %v1622_v3 = vld [vmem:[%s2098_s2 + $0x28] sm:$0xff] }
   0xa   :  { %214 = vrot.lane.b32.xlu1 %v1759_v2, %s1703_s27  ;;  %212 = vrot.lane.b32.xlu0 %v1748_v0, %s1703_s27 }
   0xe   :  { %304 = vrot.lane.b32.xlu1 %v1759_v2, %s1704_s28  ;;  %302 = vrot.lane.b32.xlu0 %v1748_v0, %s1704_s28 }
  0x12   :  { %468 = vrot.lane.b32.xlu1 %v1759_v2, %s1705_s1  ;;  %466 = vrot.lane.b32.xlu0 %v1748_v0, %s1705_s1 }
  0x16   :  { %572 = vrot.lane.b32.xlu1 %v1759_v2, %s1706_s29  ;;  %570 = vrot.lane.b32.xlu0 %v1748_v0, %s1706_s29 }
  0x1a   :  { %558 = vrot.lane.b32.xlu1 %v1759_v2, %s1707_s30  ;;  %556 = vrot.lane.b32.xlu0 %v1748_v0, %s1707_s30 }
  0x1e   :  { %734 = vrot.lane.b32.xlu1 %v1759_v2, %s1708_s7  ;;  %732 = vrot.lane.b32.xlu0 %v1748_v0, %s1708_s7 }
  0x22   :  { %28 = vperm.xlu0 %1699, %v25_v4  }
  0x74   :  { %v123_v7 = vpop.permute.xlu1 %122  ;;  %v32_v8 = vpop.permute.xlu0 %31 }
  0x78   :  { %v125_v12 = vpop.permute.xlu1 %124  ;;  %v34_v14 = vpop.permute.xlu0 %33 }
  0x79   :  { %v127_v15 = vsel %vm126_vm0, %v123_v7, %v125_v12  ;;  %v128_v16 = vsel %vm126_vm0, %v125_v12, %v123_v7  ;;  %v39_v17 = vsel %vm37_vm1, %v34_v14, %v32_v8  ;;  %v38_v18 = vsel %vm37_vm1, %v32_v8, %v34_v14  ;;  %v1943_v12 = vld [vmem:[%s2097_s0 + $0x60] sm:$0xff] }
  0x7a   :  { %v133_v19 = vmul.f32 %v1799_v9, %v127_v15  ;;  %v43_v20 = vmul.f32 %v1804_v10, %v38_v18  ;;  %v42_v21 = vmul.f32 %v1809_v11, %v39_v17  ;;  %v132_v22 = vmul.f32 %v1814_v13, %v128_v16  ;;  %v1950_v15 = vld [vmem:[%s2097_s0 + $0x88] sm:$0xff]  ;;  %v1629_v17 = vld [vmem:[%s2098_s2 + $0x38] sm:$0xff] }
  0x7c   :  { %49 = vmatprep.subr.mxu0 %v43_v20  ;;  %v215_v25 = vpop.permute.xlu1 %214  ;;  %v213_v26 = vpop.permute.xlu0 %212  ;;  %v1964_v20 = vld [vmem:[%s2097_s0 + $0x80] sm:$0xff] }
  0x7d   :  { %50 = vmatpush1.msra.mxu0 %v42_v21  ;;  %v217_v27 = vsel %vm216_vm2, %v213_v26, %v215_v25  ;;  %v218_v29 = vsel %vm216_vm2, %v215_v25, %v213_v26 }
  0x7e   :  { %1605 = vmatmul.mubr.msk.f32.vlgmr.msra.gmra.mrb[0].mxu0 %vm45_vm3, %v44_v23  ;;  %139 = vmatprep.subr.mxu0 %v133_v19  ;;  %v223_v28 = vmul.f32 %v1835_v24, %v217_v27  ;;  %v222_v31 = vmul.f32 %v1847_v30, %v218_v29  ;;  %v1634_v23 = vld [vmem:[%s2098_s2 + $0x40] sm:$0xff] }
  0x7f   :  { %140 = vmatpush1.msra.mxu0 %v132_v22  ;;  %203 = vmatprep.mubr.f32.mxu0 %v1700_v1  ;;  %v1626_v22 = vld [vmem:[%s2098_s2 + $0x30] sm:$0xff] }
  0x80   :  { %229 = vmatprep.subr.mxu0 %v223_v28  ;;  %v305_v33 = vpop.permute.xlu1 %304  ;;  %v303_v34 = vpop.permute.xlu0 %302 }
  0x81   :  { %v307_v35 = vsel %vm306_vm4, %v303_v34, %v305_v33  ;;  %v308_v41 = vsel %vm306_vm4, %v305_v33, %v303_v34  ;;  %v828_v33 = vld [vmem:[%s2099_s5] sm:$0xff] }
  0x82   :  { %v313_v38 = vmul.f32 %v1862_v36, %v307_v35  ;;  %v312_v45 = vmul.f32 %v1877_v42, %v308_v41 }
  0x84   :  { %v469_v39 = vpop.permute.xlu1 %468  ;;  %v467_v40 = vpop.permute.xlu0 %466 }
  0x85   :  { %v472_v43 = vsel %vm470_vm5, %v469_v39, %v467_v40  ;;  %v471_v50 = vsel %vm470_vm5, %v467_v40, %v469_v39 }
  0x86   :  { %1609 = vmatmul.mubr.msk.f32.vlgmr.msra.gmra.mrb[0].mxu0 %vm45_vm3, %v1608_v32  ;;  %v477_v47 = vmul.f32 %v1884_v44, %v472_v43  ;;  %v476_v54 = vmul.f32 %v1899_v51, %v471_v50  ;;  %v842_v43 = vld [vmem:[%s2100_s4] sm:$0xff] }
  0x87   :  { %230 = vmatpush1.msra.mxu0 %v222_v31  ;;  %293 = vmatprep.mubr.f32.mxu0 %v1700_v1 }
  0x88   :  { %321 = vmatprep.subr.mxu0 %v1759_v2  ;;  %v573_v48 = vpop.permute.xlu1 %572  ;;  %v571_v49 = vpop.permute.xlu0 %570 }
  0x89   :  { %v576_v52 = vsel %vm574_vm6, %v573_v48, %v571_v49  ;;  %v575_v59 = vsel %vm574_vm6, %v571_v49, %v573_v48 }
  0x8a   :  { %v581_v56 = vmul.f32 %v1906_v53, %v576_v52  ;;  %v580_v63 = vmul.f32 %v1921_v60, %v575_v59 }
  0x8c   :  { %v559_v57 = vpop.permute.xlu1 %558  ;;  %v557_v58 = vpop.permute.xlu0 %556 }
  0x8d   :  { %v562_v61 = vsel %vm560_vm7, %v559_v57, %v557_v58  ;;  %v561_v8 = vsel %vm560_vm7, %v557_v58, %v559_v57 }
  0x8e   :  { %1613 = vmatmul.mubr.msk.f32.vlgmr.msra.gmra.mrb[0].mxu0 %vm45_vm3, %v1612_v37  ;;  %v567_v4 = vmul.f32 %v1928_v62, %v562_v61  ;;  %v566_v16 = vmul.f32 %v1943_v12, %v561_v8 }
  0x8f   :  { %322 = vmatpush1.msra.mxu0 %v1748_v0  ;;  %385 = vmatprep.mubr.f32.mxu0 %v1700_v1 }
  0x90   :  { %395 = vmatprep.subr.mxu0 %v313_v38  ;;  %v735_v5 = vpop.permute.xlu1 %734  ;;  %v733_v7 = vpop.permute.xlu0 %732 }
  0x91   :  { %v738_v14 = vsel %vm736_vm8, %v735_v5, %v733_v7  ;;  %v737_v19 = vsel %vm736_vm8, %v733_v7, %v735_v5 }
  0x92   :  { %v743_v18 = vmul.f32 %v1950_v15, %v738_v14  ;;  %v742_v21 = vmul.f32 %v1964_v20, %v737_v19 }
  0x96   :  { %1618 = vmatmul.mubr.msk.f32.vlgmr.msra.gmra.mrb[0].mxu0 %vm45_vm3, %v1617_v46 }
  0x97   :  { %396 = vmatpush1.msra.mxu0 %v312_v45  ;;  %459 = vmatprep.mubr.f32.mxu0 %v1700_v1 }
  0x98   :  { %483 = vmatprep.subr.mxu0 %v477_v47 }
  0x9e   :  { %1619 = vmatmul.mubr.msk.f32.vlgmr.msra.gmra.mrb[0].mxu0 %vm45_vm3, %v1616_v55 }
  0x9f   :  { %484 = vmatpush1.msra.mxu0 %v476_v54  ;;  %547 = vmatprep.mubr.f32.mxu0 %v1700_v1 }
  0xa0   :  { %587 = vmatprep.subr.mxu0 %v581_v56 }
  0xa1   :  { %v29_v25 = vpop.permute.xlu0 %28 }
  0xa6   :  { %1623 = vmatmul.mubr.msk.f32.vlgmr.msra.gmra.mrb[0].mxu0 %vm45_vm3, %v1622_v3  ;;  %v1642_v3 = vld [vmem:[%s2100_s4 + $0x20] sm:$0xff] }
  0xa7   :  { %588 = vmatpush1.msra.mxu0 %v580_v63  ;;  %651 = vmatprep.mubr.f32.mxu0 %v1700_v1 }
  0xa8   :  { %661 = vmatprep.subr.mxu0 %v567_v4 }
  0xae   :  { %1630 = vmatmul.mubr.msk.f32.vlgmr.msra.gmra.mrb[0].mxu0 %vm45_vm3, %v1629_v17 }
  0xaf   :  { %662 = vmatpush1.msra.mxu0 %v566_v16  ;;  %725 = vmatprep.mubr.f32.mxu0 %v1700_v1 }
  0xb0   :  { %749 = vmatprep.subr.mxu0 %v743_v18 }
  0xb6   :  { %1631 = vmatmul.mubr.msk.f32.vlgmr.msra.gmra.mrb[0].mxu0 %vm45_vm3, %v1626_v22 }
  0xb7   :  { %750 = vmatpush1.msra.mxu0 %v742_v21  ;;  %813 = vmatprep.mubr.f32.mxu0 %v1700_v1 }
  0xbe   :  { %1635 = vmatmul.mubr.msk.f32.vlgmr.msra.gmra.mrb[0].mxu0 %vm45_vm3, %v1634_v23 }
 0x191   :  { %v815_v26 = vpop.f32.mrb[0].mxu0 }
 0x192   :  { %v1653_v27 = vadd.f32 %v815_v26, %v29_v25  ;;  %v817_v28 = vpop.f32.mrb[1].mxu0 }
 0x193   :  { %v1654_v31 = vadd.f32 %v817_v28, %v29_v25 }
 0x194   :  { %v826_v29 = vmax.f32 %v1653_v27, 0.0 }
 0x195   :  { %v827_v32 = vmax.f32 %v1654_v31, 0.0  ;;  %v1647_v31 = vld [vmem:[%s2100_s4 + $0x30] sm:$0xff] }
 0x196   :  { %919 = vrot.lane.b32.xlu0 %v826_v29, %s1701_s23  ;;  %834 = vrot.lane.b32.xlu1 %v826_v29, %s1702_s24 }
 0x19a   :  { %1005 = vrot.lane.b32.xlu0 %v826_v29, %s1703_s27  ;;  %836 = vrot.lane.b32.xlu1 %v827_v32, %s1702_s24 }
 0x19e   :  { %1091 = vrot.lane.b32.xlu0 %v826_v29, %s1704_s28  ;;  %921 = vrot.lane.b32.xlu1 %v827_v32, %s1701_s23 }
 0x1a2   :  { %1251 = vrot.lane.b32.xlu0 %v826_v29, %s1705_s1  ;;  %1007 = vrot.lane.b32.xlu1 %v827_v32, %s1703_s27 }
 0x1a6   :  { %1347 = vrot.lane.b32.xlu0 %v826_v29, %s1706_s29  ;;  %1093 = vrot.lane.b32.xlu1 %v827_v32, %s1704_s28 }
 0x1aa   :  { %1337 = vrot.lane.b32.xlu0 %v826_v29, %s1707_s30  ;;  %1253 = vrot.lane.b32.xlu1 %v827_v32, %s1705_s1 }
 0x1ae   :  { %1505 = vrot.lane.b32.xlu0 %v826_v29, %s1708_s7  ;;  %1349 = vrot.lane.b32.xlu1 %v827_v32, %s1706_s29 }
 0x1b2   :  { %831 = vperm.xlu0 %1699, %v828_v33   ;;  %1339 = vrot.lane.b32.xlu1 %v827_v32, %s1707_s30 }
 0x1b6   :  { %1507 = vrot.lane.b32.xlu1 %v827_v32, %s1708_s7 }
 0x208   :  { %v835_v34 = vpop.permute.xlu1 %834  ;;  %v920_v39 = vpop.permute.xlu0 %919 }
 0x20c   :  { %v837_v35 = vpop.permute.xlu1 %836 }
 0x20d   :  { %v839_v37 = vsel %vm37_vm1, %v837_v35, %v835_v34  ;;  %v838_v38 = vsel %vm37_vm1, %v835_v34, %v837_v35 }
 0x20e   :  { %v841_v40 = vmul.f32 %v838_v38, %v1804_v10  ;;  %v840_v41 = vmul.f32 %v839_v37, %v1809_v11  ;;  %v1006_v10 = vpop.permute.xlu0 %1005 }
 0x210   :  { %846 = vmatprep.subr.mxu1 %v841_v40  ;;  %v922_v45 = vpop.permute.xlu1 %921 }
 0x211   :  { %v923_v46 = vsel %vm126_vm0, %v920_v39, %v922_v45  ;;  %v924_v47 = vsel %vm126_vm0, %v922_v45, %v920_v39  ;;  %847 = vmatpush1.msra.mxu1 %v840_v41 }
 0x212   :  { %v925_v48 = vmul.f32 %v1814_v13, %v924_v47  ;;  %v926_v49 = vmul.f32 %v1799_v9, %v923_v46  ;;  %1636 = vmatmul.mubr.msk.f32.vlgmr.msra.gmra.mrb[0].mxu1 %vm45_vm3, %v842_v43  ;;  %v1637_v9 = vld [vmem:[%s2100_s4 + $0x8] sm:$0xff]  ;;  %v1092_v56 = vpop.permute.xlu0 %1091 }
 0x213   :  { %996 = vmatprep.mubr.f32.mxu1 %v1700_v1 }
 0x214   :  { %932 = vmatprep.subr.mxu1 %v926_v49  ;;  %v1008_v11 = vpop.permute.xlu1 %1007 }
 0x215   :  { %v1009_v50 = vsel %vm216_vm2, %v1006_v10, %v1008_v11  ;;  %933 = vmatpush1.msra.mxu1 %v925_v48  ;;  %v1010_v52 = vsel %vm216_vm2, %v1008_v11, %v1006_v10 }
 0x216   :  { %v1012_v54 = vmul.f32 %v1835_v24, %v1009_v50  ;;  %v1011_v13 = vmul.f32 %v1847_v30, %v1010_v52  ;;  %v1639_v24 = vld [vmem:[%s2100_s4 + $0x10] sm:$0xff]  ;;  %v1252_v59 = vpop.permute.xlu0 %1251 }
 0x218   :  { %1018 = vmatprep.subr.mxu1 %v1012_v54  ;;  %v1094_v55 = vpop.permute.xlu1 %1093 }
 0x219   :  { %v1095_v57 = vsel %vm306_vm4, %v1092_v56, %v1094_v55  ;;  %v1096_v61 = vsel %vm306_vm4, %v1094_v55, %v1092_v56 }
 0x21a   :  { %1638 = vmatmul.mubr.msk.f32.vlgmr.msra.gmra.mrb[0].mxu1 %vm45_vm3, %v1637_v9  ;;  %v1098_v58 = vmul.f32 %v1862_v36, %v1095_v57  ;;  %v1097_v36 = vmul.f32 %v1877_v42, %v1096_v61  ;;  %v1348_v7 = vpop.permute.xlu0 %1347  ;;  %v1641_v42 = vld [vmem:[%s2100_s4 + $0x18] sm:$0xff] }
 0x21b   :  { %1019 = vmatpush1.msra.mxu1 %v1011_v13  ;;  %1082 = vmatprep.mubr.f32.mxu1 %v1700_v1 }
 0x21c   :  { %1106 = vmatprep.subr.mxu1 %v827_v32  ;;  %v1254_v30 = vpop.permute.xlu1 %1253 }
 0x21d   :  { %v1256_v63 = vsel %vm470_vm5, %v1254_v30, %v1252_v59  ;;  %v1255_v8 = vsel %vm470_vm5, %v1252_v59, %v1254_v30 }
 0x21e   :  { %v1258_v4 = vmul.f32 %v1884_v44, %v1256_v63  ;;  %v1257_v44 = vmul.f32 %v1899_v51, %v1255_v8  ;;  %v1338_v18 = vpop.permute.xlu0 %1337  ;;  %v1645_v51 = vld [vmem:[%s2100_s4 + $0x28] sm:$0xff] }
 0x220   :  { %v1350_v5 = vpop.permute.xlu1 %1349 }
 0x221   :  { %v1352_v14 = vsel %vm574_vm6, %v1350_v5, %v1348_v7  ;;  %v1351_v19 = vsel %vm574_vm6, %v1348_v7, %v1350_v5 }
 0x222   :  { %1640 = vmatmul.mubr.msk.f32.vlgmr.msra.gmra.mrb[0].mxu1 %vm45_vm3, %v1639_v24  ;;  %v1354_v16 = vmul.f32 %v1906_v53, %v1352_v14  ;;  %v1353_v53 = vmul.f32 %v1921_v60, %v1351_v19  ;;  %v1506_v25 = vpop.permute.xlu0 %1505  ;;  %v1648_v60 = vld [vmem:[%s2100_s4 + $0x38] sm:$0xff] }
 0x223   :  { %1107 = vmatpush1.msra.mxu1 %v826_v29  ;;  %1170 = vmatprep.mubr.f32.mxu1 %v1700_v1 }
 0x224   :  { %1180 = vmatprep.subr.mxu1 %v1098_v58  ;;  %v1340_v17 = vpop.permute.xlu1 %1339 }
 0x225   :  { %v1342_v21 = vsel %vm560_vm7, %v1340_v17, %v1338_v18  ;;  %v1341_v26 = vsel %vm560_vm7, %v1338_v18, %v1340_v17 }
 0x226   :  { %v1344_v22 = vmul.f32 %v1928_v62, %v1342_v21  ;;  %v1343_v62 = vmul.f32 %v1943_v12, %v1341_v26  ;;  %v1651_v12 = vld [vmem:[%s2100_s4 + $0x40] sm:$0xff] }
 0x228   :  { %v1508_v23 = vpop.permute.xlu1 %1507 }
 0x229   :  { %v1510_v27 = vsel %vm736_vm8, %v1508_v23, %v1506_v25  ;;  %v1509_v29 = vsel %vm736_vm8, %v1506_v25, %v1508_v23 }
 0x22a   :  { %1643 = vmatmul.mubr.msk.f32.vlgmr.msra.gmra.mrb[0].mxu1 %vm45_vm3, %v1642_v3  ;;  %v1512_v28 = vmul.f32 %v1950_v15, %v1510_v27  ;;  %v1511_v32 = vmul.f32 %v1964_v20, %v1509_v29 }
 0x22b   :  { %1181 = vmatpush1.msra.mxu1 %v1097_v36  ;;  %1244 = vmatprep.mubr.f32.mxu1 %v1700_v1 }
 0x22c   :  { %1264 = vmatprep.subr.mxu1 %v1258_v4 }
 0x231   :  { %v832_v15 = vpop.permute.xlu0 %831 }
 0x232   :  { %1644 = vmatmul.mubr.msk.f32.vlgmr.msra.gmra.mrb[0].mxu1 %vm45_vm3, %v1641_v42 }
 0x233   :  { %1265 = vmatpush1.msra.mxu1 %v1257_v44  ;;  %1328 = vmatprep.mubr.f32.mxu1 %v1700_v1 }
 0x234   :  { %1360 = vmatprep.subr.mxu1 %v1354_v16 }
 0x23a   :  { %1646 = vmatmul.mubr.msk.f32.vlgmr.msra.gmra.mrb[0].mxu1 %vm45_vm3, %v1645_v51 }
 0x23b   :  { %1361 = vmatpush1.msra.mxu1 %v1353_v53  ;;  %1424 = vmatprep.mubr.f32.mxu1 %v1700_v1 }
 0x23c   :  { %1434 = vmatprep.subr.mxu1 %v1344_v22 }
 0x242   :  { %1649 = vmatmul.mubr.msk.f32.vlgmr.msra.gmra.mrb[0].mxu1 %vm45_vm3, %v1648_v60 }
 0x243   :  { %1435 = vmatpush1.msra.mxu1 %v1343_v62  ;;  %1498 = vmatprep.mubr.f32.mxu1 %v1700_v1 }
 0x244   :  { %1518 = vmatprep.subr.mxu1 %v1512_v28 }
 0x24a   :  { %1650 = vmatmul.mubr.msk.f32.vlgmr.msra.gmra.mrb[0].mxu1 %vm45_vm3, %v1647_v31 }
 0x24b   :  { %1519 = vmatpush1.msra.mxu1 %v1511_v32  ;;  %1582 = vmatprep.mubr.f32.mxu1 %v1700_v1 }
 0x252   :  { %1652 = vmatmul.mubr.msk.f32.vlgmr.msra.gmra.mrb[0].mxu1 %vm45_vm3, %v1651_v12 }
 0x325   :  { %v1584_v6 = vpop.f32.mrb[0].mxu1 }
 0x326   :  { %v1655_v33 = vadd.f32 %v1584_v6, %v832_v15  ;;  %v1586_v34 = vpop.f32.mrb[1].mxu1 }
 0x327   :  { %v1656_v35 = vadd.f32 %v1586_v34, %v832_v15 }
 0x328   :  { %v1595_v37 = vmul.f32 0.1, %v1655_v33 }
 0x329   :  { %v1596_v38 = vmul.f32 0.1, %v1656_v35 }
 0x32a   :  { %v1597_v20 = vadd.f32 %v1595_v37, %v1748_v0 }
 0x32b   :  { %v1598_v39 = vadd.f32 %v1596_v38, %v1759_v2 }
 0x32c   :  { %1599 = vst [vmem:[%s2101_s6] sm:$0xff] %v1597_v20 }
 0x32d   :  { %1600 = vst [vmem:[%s2101_s6 + $0x8] sm:$0xff] %v1598_v39 }

</bundles_post_ra>
